<compile_context>
chip_gen: v6e
topology: v6e:2x2x1
jax: 0.10.0
libtpu: 0.0.40
codegen_flags: <defaults>
</compile_context>

<pallas_src>
import math
from functools import partial

import jax
import jax.numpy as jnp
from jax.experimental import pallas as pl
from jax.experimental.pallas import tpu as pltpu


def _round_up(x, m):
    return ((x + m - 1) // m) * m


def _sigmoid_via_tanh(z):
    # sigmoid(z) = 0.5 * (tanh(0.5*z) + 1): single EUP op, epilogue hides
    # under the MXU work.
    return 0.5 * (jnp.tanh(0.5 * z) + 1.0)


def layer_fwd_kernel(x_ref, w_ref, o_ref, acc_ref):
    """One (tm, tn) output tile; K reduced across grid axis 2 into f32 acc."""
    k = pl.program_id(2)

    @pl.when(k == 0)
    def _():
        acc_ref[...] = jnp.zeros_like(acc_ref)

    acc_ref[...] += jnp.dot(
        x_ref[...], w_ref[...], preferred_element_type=jnp.float32
    )

    @pl.when(k == pl.num_programs(2) - 1)
    def _():
        o_ref[...] = _sigmoid_via_tanh(acc_ref[...]).astype(o_ref.dtype)


def layer_fwd_kernel_single_k(x_ref, w_ref, o_ref):
    """Full-K block per output tile: no scratch accumulator needed."""
    z = jnp.dot(x_ref[...], w_ref[...], preferred_element_type=jnp.float32)
    o_ref[...] = _sigmoid_via_tanh(z).astype(o_ref.dtype)


@partial(jax.jit, static_argnames=("tm", "tn", "tk"))
def layer_forward(x, w, *, tm=256, tn=256, tk=512):
    """sigmoid(x @ w) via a tiled Pallas TPU kernel with K accumulation."""
    M, K = x.shape
    K2, N = w.shape
    assert K == K2, "inner dimensions must match"
    out_dtype = x.dtype

    # ---- per-shape tile selection (multiples of (8, 128), MXU-aligned) ----
    tm = min(tm, _round_up(M, 8))
    n_pad = _round_up(N, 128)
    if n_pad % tn != 0:
        tn = 128
    tn = min(tn, n_pad)
    if K <= tk:
        tk = K                      # full-K block; no K padding needed
        k_pad = K
    else:
        k_pad = _round_up(K, tk)    # tk=512: multiple of both 8 and 128
    m_pad = _round_up(M, tm)

    # ---- zero-pad inputs to tile multiples (zeros add nothing to the dot) --
    if (m_pad, k_pad) != (M, K):
        x = jnp.pad(x, ((0, m_pad - M), (0, k_pad - K)))
    if (k_pad, n_pad) != (K, N):
        w = jnp.pad(w, ((0, k_pad - K), (0, n_pad - N)))

    grid_m, grid_n, grid_k = m_pad // tm, n_pad // tn, k_pad // tk

    cost = pl.CostEstimate(
        flops=2 * M * K * N,
        transcendentals=M * N,
        bytes_accessed=(M * K + K * N + M * N) * x.dtype.itemsize,
    )

    if grid_k == 1:
        # Fast path: whole K in one block, write the tile directly.
        out = pl.pallas_call(
            layer_fwd_kernel_single_k,
            out_shape=jax.ShapeDtypeStruct((m_pad, n_pad), out_dtype),
            grid_spec=pltpu.PrefetchScalarGridSpec(
                num_scalar_prefetch=0,
                grid=(grid_m, grid_n),
                in_specs=[
                    pl.BlockSpec((tm, k_pad), lambda i, j: (i, 0)),
                    pl.BlockSpec((k_pad, tn), lambda i, j: (0, j)),
                ],
                out_specs=pl.BlockSpec((tm, tn), lambda i, j: (i, j)),
            ),
            compiler_params=pltpu.CompilerParams(
                dimension_semantics=("parallel", "parallel"),
            ),
            cost_estimate=cost,
        )(x, w)
    else:
        out = pl.pallas_call(
            layer_fwd_kernel,
            out_shape=jax.ShapeDtypeStruct((m_pad, n_pad), out_dtype),
            grid_spec=pltpu.PrefetchScalarGridSpec(
                num_scalar_prefetch=0,
                grid=(grid_m, grid_n, grid_k),
                in_specs=[
                    pl.BlockSpec((tm, tk), lambda i, j, k: (i, k)),  # x tile
                    pl.BlockSpec((tk, tn), lambda i, j, k: (k, j)),  # w tile
                ],
                out_specs=pl.BlockSpec((tm, tn), lambda i, j, k: (i, j)),
                scratch_shapes=[pltpu.VMEM((tm, tn), jnp.float32)],  # f32 acc
            ),
            compiler_params=pltpu.CompilerParams(
                dimension_semantics=("parallel", "parallel", "arbitrary"),
            ),
            cost_estimate=cost,
        )(x, w)

    if (m_pad, n_pad) != (M, N):
        out = out[:M, :N]
    return out


def init_weight(key, in_features, out_features):
    # Mirrors: torch.randn(in_features, out_features) / sqrt(in_features)
    return jax.random.normal(
        key, (in_features, out_features), jnp.float32
    ) / math.sqrt(in_features)


# TODO(synk): BatchNorm1d branch is dead code (WITH_BN=False) and the
# `self.output` attribute side-effect has no Pallas equivalent; both omitted.

if __name__ == "__main__":
    key = jax.random.PRNGKey(0)
    k_x, k_w, k_x2, k_w2 = jax.random.split(key, 4)

    # Case 1: small tile-aligned shapes, float32 (tight tolerance).
    batch, in_features, out_features = 16, 32, 128
    x = jax.random.normal(k_x, (batch, in_features), jnp.float32)
    w = init_weight(k_w, in_features, out_features)
    out = layer_forward(x, w)
    jax.block_until_ready(out)
    ref = jax.nn.sigmoid(x @ w)
    assert out.shape == ref.shape
    assert jnp.allclose(out, ref, atol=1e-4, rtol=1e-4), "f32 aligned mismatch"

    # Case 2: shapes that need padding on every axis, float32.
    x2 = jax.random.normal(k_x2, (10, 48), jnp.float32)
    w2 = init_weight(k_w2, 48, 200)
    out2 = layer_forward(x2, w2)
    jax.block_until_ready(out2)
    ref2 = jax.nn.sigmoid(x2 @ w2)
    assert out2.shape == ref2.shape
    assert jnp.allclose(out2, ref2, atol=1e-4, rtol=1e-4), "f32 padded mismatch"

    # Case 3: bf16 inputs (MXU-native on v6e/v7x), f32 accumulation inside.
    xb = x.astype(jnp.bfloat16)
    wb = w.astype(jnp.bfloat16)
    out3 = layer_forward(xb, wb)
    jax.block_until_ready(out3)
    ref3 = jax.nn.sigmoid(xb.astype(jnp.float32) @ wb.astype(jnp.float32))
    assert jnp.allclose(
        out3.astype(jnp.float32), ref3, atol=2e-2, rtol=2e-2
    ), "bf16 mismatch"

    print("KERNEL_OK")
</pallas_src>

<mosaic_0001>
module attributes {stable_mosaic.version = 11 : i64} {
  func.func @layer_fwd_kernel_single_k(%arg0: i32, %arg1: i32, %arg2: memref<16x32xf32, #tpu.memory_space<vmem>>, %arg3: memref<32x128xf32, #tpu.memory_space<vmem>>, %arg4: memref<16x128xf32, #tpu.memory_space<vmem>>) attributes {dimension_semantics = [#tpu.dimension_semantics<parallel>, #tpu.dimension_semantics<parallel>], iteration_bounds = array<i64: 1, 1>, scalar_prefetch = 0 : i64, scratch_operands = 0 : i64, tpu.core_type = #tpu.core_type<tc>, window_params = [{transform_indices = @transform_0, window_bounds = array<i64: 16, 32>}, {transform_indices = @transform_1, window_bounds = array<i64: 32, 128>}, {transform_indices = @transform_2, window_bounds = array<i64: 16, 128>}]} {
    %c0 = arith.constant 0 : index
    %c0_0 = arith.constant 0 : index
    %0 = vector.load %arg2[%c0, %c0_0] : memref<16x32xf32, #tpu.memory_space<vmem>>, vector<16x32xf32>
    %c0_1 = arith.constant 0 : index
    %c0_2 = arith.constant 0 : index
    %1 = vector.load %arg3[%c0_1, %c0_2] : memref<32x128xf32, #tpu.memory_space<vmem>>, vector<32x128xf32>
    %cst = arith.constant dense<0.000000e+00> : vector<16x128xf32>
    %2 = tpu.matmul %0, %1, %cst {dimension_numbers = #tpu.dot_dimension_numbers<[1], [0], [0], [1], [0, 0, 1, 1], [], []>} : vector<16x32xf32>, vector<32x128xf32>, vector<16x128xf32> -> vector<16x128xf32>
    %cst_3 = arith.constant 5.000000e-01 : f32
    %3 = vector.broadcast %cst_3 : f32 to vector<16x128xf32>
    %4 = arith.mulf %3, %2 : vector<16x128xf32>
    %5 = math.tanh %4 : vector<16x128xf32>
    %cst_4 = arith.constant 1.000000e+00 : f32
    %6 = vector.broadcast %cst_4 : f32 to vector<16x128xf32>
    %7 = arith.addf %5, %6 : vector<16x128xf32>
    %cst_5 = arith.constant 5.000000e-01 : f32
    %8 = vector.broadcast %cst_5 : f32 to vector<16x128xf32>
    %9 = arith.mulf %8, %7 : vector<16x128xf32>
    %c0_6 = arith.constant 0 : index
    %c0_7 = arith.constant 0 : index
    %10 = vector.load %arg4[%c0_6, %c0_7] : memref<16x128xf32, #tpu.memory_space<vmem>>, vector<16x128xf32>
    tpu.vector_store %arg4[%c0_6, %c0_7], %9 {strides = array<i32>} : memref<16x128xf32, #tpu.memory_space<vmem>>, vector<16x128xf32>,
    return
  }
  func.func @transform_0(%arg0: i32, %arg1: i32) -> (i32, i32) {
    %c0_i32 = arith.constant 0 : i32
    %c0_i32_0 = arith.constant 0 : i32
    return %arg0, %c0_i32 : i32, i32
  }
  func.func @transform_1(%arg0: i32, %arg1: i32) -> (i32, i32) {
    %c0_i32 = arith.constant 0 : i32
    %c0_i32_0 = arith.constant 0 : i32
    return %c0_i32, %arg1 : i32, i32
  }
  func.func @transform_2(%arg0: i32, %arg1: i32) -> (i32, i32) {
    %c0_i32 = arith.constant 0 : i32
    return %arg0, %arg1 : i32, i32
  }
}

</mosaic_0001>

<bundles_post_ra>
// kernel: layer_forward.1
= control target key start
LH: loop header
LB: loop body
LE: loop exit
PB: predicated region body
PF: predicated region fallthrough
CT: control target
= control target key end

     0   :  { %7 = vsyncpa [#allocation3], 0  ;;  %s290_s0 = inlined_call_operand.hbm [shape: f32[16,32], index: 0, kind: input, shape index: {}]   ;;  %s291_s1 = inlined_call_operand.hbm [shape: f32[32,128], index: 1, kind: input, shape index: {}]   ;;  %s292_s2 = inlined_call_operand.hbm [shape: f32[16,128], index: 2, kind: output, shape index: {}]  }
   0x1   :  { %8 = vsyncpa [#allocation6], 0 }
   0x2   :  { %9 = vsyncpa [#allocation4], 0  ;;  %s250_s9 = smov [#allocation2]  }
   0x3   :  { %s15_s10 = sshll.u32 %s250_s9, 4  ;;  %s16_s10 = int_to_ptr.vmem [resolvable:$true] %s15_s10 }
   0x4   :  { %s192_s11 = scalar_lea.vmem %s16_s10, 256  ;;  %p197_p1 = scmp.lt.s32.totalorder %s16_s10, %s16_s10 }
   0x5   :  { %p193_p0 = scmp.ne.s32.totalorder %s16_s10, %s192_s11  ;;  %p198_p2 = scmp.lt.s32.totalorder %s192_s11, %s192_s11 }
   0x7   :  { %p199_p3 = por %p198_p2, %p197_p1 }
   0x9   :  { %p200_p4 = pnand %p199_p3, %p193_p0 }
   0xb   :  { %203 = shalt.err (!%p200_p4)
}
   0xc   :  { %s251_s12 = smov 128   ;;  %s252_s13 = smov 8  }
   0xd   :  { %21 = dma.hbm_to_vmem [thread:$0]  %s290_s0, 256, %s16_s10, [#allocation3], %s251_s12, %s251_s12, %s252_s13  }
   0xe   :  { %s253_s16 = smov [#allocation5]  }
   0xf   :  { %s27_s17 = sshll.u32 %s253_s16, 4  ;;  %s28_s17 = int_to_ptr.vmem [resolvable:$true] %s27_s17 }
  0x10   :  { %s212_s18 = scalar_lea.vmem %s28_s17, 512  ;;  %p217_p6 = scmp.lt.s32.totalorder %s28_s17, %s28_s17 }
  0x11   :  { %p213_p5 = scmp.ne.s32.totalorder %s28_s17, %s212_s18  ;;  %p218_p7 = scmp.lt.s32.totalorder %s212_s18, %s212_s18 }
  0x13   :  { %p219_p8 = por %p218_p7, %p217_p6 }
  0x15   :  { %p220_p9 = pnand %p219_p8, %p213_p5 }
  0x17   :  { %223 = shalt.err (!%p220_p9)
}
  0x18   :  { %33 = dma.hbm_to_vmem [thread:$0]  %s291_s1, 512, %s28_s17, [#allocation6], %s251_s12, %s251_s12, %s252_s13  }
  0x19   :  { %244 = dma.done.wait [#allocation3], 256  }
  0x1a   :  { %245 = vsyncadd [#allocation3], 4294967040 }
  0x1b   :  { %246 = dma.done.wait [#allocation6], 512  }
  0x1c   :  { %247 = vsyncadd [#allocation6], 4294966784  ;;  %vm46_vm0 = vcmask 261120   ;;  %v45_v0 = vld [vmem:[#allocation5 + $0x18] sm:$0xff]  ;;  %v44_v1 = vld [vmem:[#allocation5 + $0x10] sm:$0xff]  ;;  %s254_s0 = smov [#allocation7]  }
  0x1d   :  { %164 = vmatprep.subr.mxu0 %v45_v0  ;;  %v40_v2 = vld [vmem:[#allocation2] sm:$0xff]  ;;  %v43_v3 = vld [vmem:[#allocation5 + $0x8] sm:$0xff]  ;;  %v42_v4 = vld [vmem:[#allocation5] sm:$0xff]  ;;  %s143_s1 = sshll.u32 %s254_s0, 4  ;;  %s144_s1 = int_to_ptr.vmem [resolvable:$true] %s143_s1 }
  0x1e   :  { %165 = vmatpush3.msra.mxu0 %v45_v0  ;;  %172 = vmatprep.mubr.msk.f32.mxu0 %vm46_vm0, %v40_v2  ;;  %v41_v5 = vld [vmem:[#allocation2 + $0x8] sm:$0xff]  ;;  %s224_s21 = scalar_lea.vmem %s144_s1, 256  ;;  %p229_p11 = scmp.lt.s32.totalorder %s144_s1, %s144_s1 }
  0x1f   :  { %166 = vmatprep.subr.mxu0 %v44_v1  ;;  %p225_p10 = scmp.ne.s32.totalorder %s144_s1, %s224_s21  ;;  %p230_p12 = scmp.lt.s32.totalorder %s224_s21, %s224_s21 }
  0x20   :  { %167 = vmatpush3.msra.mxu0 %v44_v1 }
  0x21   :  { %168 = vmatprep.subr.mxu0 %v43_v3  ;;  %p231_p13 = por %p230_p12, %p229_p11 }
  0x22   :  { %169 = vmatpush3.msra.mxu0 %v43_v3 }
  0x23   :  { %170 = vmatprep.subr.mxu0 %v42_v4  ;;  %p232_p0 = pnand %p231_p13, %p225_p10 }
  0x24   :  { %171 = vmatpush3.msra.mxu0 %v42_v4 }
  0x25   :  { %173 = vmatmul.mubr.msk.f32.vlgmr.msra.gmra.mxu0 %vm46_vm0, %v41_v5 }
  0xe5   :  { %v174_v6 = vpop.f32.mrf.mxu0 }
  0xe6   :  { %v129_v7 = vmul.f32 0.5, %v174_v6 }
  0xe7   :  { %v119_v8 = vpop.f32.mrf.mxu0 }
  0xe8   :  { %180 = vtanh.f32 %v129_v7  ;;  %v128_v9 = vmul.f32 0.5, %v119_v8 }
  0xea   :  { %182 = vtanh.f32 %v128_v9 }
  0xf5   :  { %v181_v10 = vpop.eup %180 }
  0xf6   :  { %v133_v11 = vadd.f32 1.0, %v181_v10 }
  0xf7   :  { %v183_v12 = vpop.eup %182 }
  0xf8   :  { %v135_v13 = vmul.f32 0.5, %v133_v11  ;;  %v132_v14 = vadd.f32 1.0, %v183_v12 }
  0xfa   :  { %137 = vst [vmem:[#allocation7 + $0x8] sm:$0xff] %v135_v13  ;;  %v134_v15 = vmul.f32 0.5, %v132_v14 }
  0xfc   :  { %136 = vst [vmem:[#allocation7] sm:$0xff] %v134_v15 }
  0xfd   :  { %235 = shalt.err (!%p232_p0)
}
  0xfe   :  { %149 = dma.vmem_to_hbm [thread:$0]  %s144_s1, 256, %s292_s2, [#allocation4], %s251_s12, %s251_s12, %s252_s13  }
  0xff   :  { %248 = dma.done.wait [#allocation4], 256  }
 0x100   :  { %249 = vsyncadd [#allocation4], 4294967040 }
 0x101   :  { %153 = vsyncpa [#allocation3], 1 }
 0x102   :  { %154 = vsyncpa [#allocation6], 1 }
 0x103   :  { %155 = vsyncpa [#allocation4], 1 }

</bundles_post_ra>
